<compile_context>
chip_gen: v7x
topology: tpu7x:2x2x1
jax: 0.10.0
libtpu: 0.0.40
codegen_flags: <defaults>
</compile_context>

<pallas_src>
import jax
import jax.numpy as jnp
from jax.experimental import pallas as pl
from jax.experimental.pallas import tpu as pltpu


def _round_up(x, m):
    return ((x + m - 1) // m) * m


def _ffn_kernel(x_ref, w1_ref, b1_ref, w2_ref, b2_ref, o_ref):
    # x_ref : [TM, D]   w1_ref: [D, H]   b1_ref: [1, H]
    # w2_ref: [H, D]    b2_ref: [1, D]   o_ref : [TM, D]
    # First linear: native-dtype operands on the MXU, f32 accumulation.
    h = jnp.dot(x_ref[...], w1_ref[...], preferred_element_type=jnp.float32)
    h = h + b1_ref[...].astype(jnp.float32)          # broadcast over rows
    h = h * jax.nn.sigmoid(h)                        # SiLU on f32 accumulator

    # (Dropout is identity in eval mode.)

    # Second linear: downcast the activation once to the weight dtype for the MXU.
    out = jnp.dot(h.astype(w2_ref.dtype), w2_ref[...],
                  preferred_element_type=jnp.float32)
    out = out + b2_ref[...].astype(jnp.float32)

    o_ref[...] = out.astype(o_ref.dtype)


def feed_forward(x, w1, b1, w2, b2, *, tm=512):
    """x: [..., dim]; returns same shape. Weights: w1 [dim, hidden], w2 [hidden, dim]."""
    orig_shape = x.shape
    dim = orig_shape[-1]
    hidden = w1.shape[1]
    x2d = x.reshape(-1, dim)
    tokens = x2d.shape[0]

    # Lane-dense (128-aligned) feature dims; token tile multiple of 16 sublanes.
    dp = _round_up(dim, 128)
    hp = _round_up(hidden, 128)
    tm = max(16, min(_round_up(tm, 16), _round_up(tokens, 16)))
    tp = _round_up(tokens, tm)
    n_tiles = tp // tm

    # Zero padding is inert: padded input cols hit zero weight rows, padded hidden
    # cols get zero bias (SiLU(0)=0), padded output cols are sliced away.
    x_p = jnp.pad(x2d, ((0, tp - tokens), (0, dp - dim)))
    w1_p = jnp.pad(w1, ((0, dp - dim), (0, hp - hidden)))
    b1_p = jnp.pad(b1, (0, hp - hidden)).reshape(1, hp)
    w2_p = jnp.pad(w2, ((0, hp - hidden), (0, dp - dim)))
    b2_p = jnp.pad(b2, (0, dp - dim)).reshape(1, dp)

    # VMEM budget: resident weights + double-buffered activation tiles + f32
    # intermediates, with headroom; clamped to stay sane across v5e/v6e/v7x.
    a_bytes = jnp.dtype(x.dtype).itemsize
    w_bytes = jnp.dtype(w1.dtype).itemsize
    resident = (dp * hp + hp * dp) * w_bytes + (hp + dp) * 4
    act_tiles = 2 * 2 * tm * dp * a_bytes                 # x & out, double-buffered
    interm = tm * hp * 4 + tm * dp * 4                    # f32 h and f32 out acc
    needed = resident + act_tiles + interm
    vmem_limit = int(min(max(needed + (8 << 20), 32 << 20), 100 << 20))

    cost = pl.CostEstimate(
        flops=4 * tp * dp * hp,                           # two matmuls, 2*M*N*K each
        transcendentals=tp * hp,                          # sigmoid in SiLU
        bytes_accessed=(tp * dp * 2) * a_bytes + resident,
    )

    out2d = pl.pallas_call(
        _ffn_kernel,
        out_shape=jax.ShapeDtypeStruct((tp, dp), x.dtype),
        grid_spec=pltpu.PrefetchScalarGridSpec(
            num_scalar_prefetch=0,
            grid=(n_tiles,),
            in_specs=[
                pl.BlockSpec((tm, dp), lambda i: (i, 0)),   # x tile (pipelined)
                pl.BlockSpec((dp, hp), lambda i: (0, 0)),   # w1 resident
                pl.BlockSpec((1, hp), lambda i: (0, 0)),    # b1 resident
                pl.BlockSpec((hp, dp), lambda i: (0, 0)),   # w2 resident
                pl.BlockSpec((1, dp), lambda i: (0, 0)),    # b2 resident
            ],
            out_specs=pl.BlockSpec((tm, dp), lambda i: (i, 0)),
        ),
        compiler_params=pltpu.CompilerParams(
            dimension_semantics=("parallel",),
            vmem_limit_bytes=vmem_limit,
        ),
        cost_estimate=cost,
    )(x_p, w1_p, b1_p, w2_p, b2_p)

    return out2d[:tokens, :dim].reshape(orig_shape)


def _init_params(key, dim, hidden_dim, dtype=jnp.float32):
    # Deterministic init mimicking nn.Linear's uniform(-1/sqrt(fan_in), 1/sqrt(fan_in)).
    k1, k2, k3, k4 = jax.random.split(key, 4)
    bound1 = 1.0 / (dim ** 0.5)
    bound2 = 1.0 / (hidden_dim ** 0.5)
    # Stored as [in, out] (transposed vs. PyTorch's [out, in]).
    w1 = jax.random.uniform(k1, (dim, hidden_dim), dtype, -bound1, bound1)
    b1 = jax.random.uniform(k2, (hidden_dim,), dtype, -bound1, bound1)
    w2 = jax.random.uniform(k3, (hidden_dim, dim), dtype, -bound2, bound2)
    b2 = jax.random.uniform(k4, (dim,), dtype, -bound2, bound2)
    return w1, b1, w2, b2


def _reference(x, w1, b1, w2, b2):
    h = x.astype(jnp.float32) @ w1.astype(jnp.float32) + b1.astype(jnp.float32)
    h = h * jax.nn.sigmoid(h)
    return (h @ w2.astype(jnp.float32) + b2.astype(jnp.float32)).astype(x.dtype)


if __name__ == "__main__":
    key = jax.random.PRNGKey(0)
    kx, kp = jax.random.split(key)

    batch, seq, dim, hidden = 2, 8, 32, 64
    x = jax.random.normal(kx, (batch, seq, dim), dtype=jnp.float32)
    w1, b1, w2, b2 = _init_params(kp, dim, hidden)

    out = feed_forward(x, w1, b1, w2, b2)
    out = jax.block_until_ready(out)

    ref = _reference(x, w1, b1, w2, b2)
    assert out.shape == x.shape
    assert jnp.allclose(out, ref, atol=1e-4, rtol=1e-4)

    print("KERNEL_OK")
</pallas_src>

<mosaic_0001>
module attributes {stable_mosaic.version = 11 : i64} {
  func.func @_ffn_kernel(%arg0: i32, %arg1: memref<16x128xf32, #tpu.memory_space<vmem>>, %arg2: memref<128x128xf32, #tpu.memory_space<vmem>>, %arg3: memref<1x128xf32, #tpu.memory_space<vmem>>, %arg4: memref<128x128xf32, #tpu.memory_space<vmem>>, %arg5: memref<1x128xf32, #tpu.memory_space<vmem>>, %arg6: memref<16x128xf32, #tpu.memory_space<vmem>>) attributes {dimension_semantics = [#tpu.dimension_semantics<parallel>], iteration_bounds = array<i64: 1>, scalar_prefetch = 0 : i64, scratch_operands = 0 : i64, tpu.core_type = #tpu.core_type<tc>, window_params = [{transform_indices = @transform_0, window_bounds = array<i64: 16, 128>}, {pipeline_mode = #tpu.pipeline_mode<synchronous>, transform_indices = @transform_1, window_bounds = array<i64: 128, 128>}, {pipeline_mode = #tpu.pipeline_mode<synchronous>, transform_indices = @transform_2, window_bounds = array<i64: 1, 128>}, {pipeline_mode = #tpu.pipeline_mode<synchronous>, transform_indices = @transform_3, window_bounds = array<i64: 128, 128>}, {pipeline_mode = #tpu.pipeline_mode<synchronous>, transform_indices = @transform_4, window_bounds = array<i64: 1, 128>}, {transform_indices = @transform_5, window_bounds = array<i64: 16, 128>}]} {
    %c0 = arith.constant 0 : index
    %c0_0 = arith.constant 0 : index
    %0 = vector.load %arg1[%c0, %c0_0] : memref<16x128xf32, #tpu.memory_space<vmem>>, vector<16x128xf32>
    %c0_1 = arith.constant 0 : index
    %c0_2 = arith.constant 0 : index
    %1 = vector.load %arg2[%c0_1, %c0_2] : memref<128x128xf32, #tpu.memory_space<vmem>>, vector<128x128xf32>
    %cst = arith.constant dense<0.000000e+00> : vector<16x128xf32>
    %2 = tpu.matmul %0, %1, %cst {dimension_numbers = #tpu.dot_dimension_numbers<[1], [0], [0], [1], [0, 0, 1, 1], [], []>} : vector<16x128xf32>, vector<128x128xf32>, vector<16x128xf32> -> vector<16x128xf32>
    %c0_3 = arith.constant 0 : index
    %c0_4 = arith.constant 0 : index
    %3 = vector.load %arg3[%c0_3, %c0_4] : memref<1x128xf32, #tpu.memory_space<vmem>>, vector<1x128xf32>
    %4 = vector.broadcast %3 : vector<1x128xf32> to vector<16x128xf32>
    %5 = arith.addf %2, %4 : vector<16x128xf32>
    %6 = arith.negf %5 : vector<16x128xf32>
    %7 = math.exp %6 : vector<16x128xf32>
    %cst_5 = arith.constant 1.000000e+00 : f32
    %8 = vector.broadcast %cst_5 : f32 to vector<16x128xf32>
    %9 = arith.addf %8, %7 : vector<16x128xf32>
    %10 = arith.divf %8, %9 : vector<16x128xf32>
    %11 = arith.mulf %5, %10 : vector<16x128xf32>
    %c0_6 = arith.constant 0 : index
    %c0_7 = arith.constant 0 : index
    %12 = vector.load %arg4[%c0_6, %c0_7] : memref<128x128xf32, #tpu.memory_space<vmem>>, vector<128x128xf32>
    %cst_8 = arith.constant dense<0.000000e+00> : vector<16x128xf32>
    %13 = tpu.matmul %11, %12, %cst_8 {dimension_numbers = #tpu.dot_dimension_numbers<[1], [0], [0], [1], [0, 0, 1, 1], [], []>} : vector<16x128xf32>, vector<128x128xf32>, vector<16x128xf32> -> vector<16x128xf32>
    %c0_9 = arith.constant 0 : index
    %c0_10 = arith.constant 0 : index
    %14 = vector.load %arg5[%c0_9, %c0_10] : memref<1x128xf32, #tpu.memory_space<vmem>>, vector<1x128xf32>
    %15 = vector.broadcast %14 : vector<1x128xf32> to vector<16x128xf32>
    %16 = arith.addf %13, %15 : vector<16x128xf32>
    %c0_11 = arith.constant 0 : index
    %c0_12 = arith.constant 0 : index
    %17 = vector.load %arg6[%c0_11, %c0_12] : memref<16x128xf32, #tpu.memory_space<vmem>>, vector<16x128xf32>
    tpu.vector_store %arg6[%c0_11, %c0_12], %16 {strides = array<i32>} : memref<16x128xf32, #tpu.memory_space<vmem>>, vector<16x128xf32>,
    return
  }
  func.func @transform_0(%arg0: i32) -> (i32, i32) {
    %c0_i32 = arith.constant 0 : i32
    %c0_i32_0 = arith.constant 0 : i32
    return %arg0, %c0_i32 : i32, i32
  }
  func.func @transform_1(%arg0: i32) -> (i32, i32) {
    %c0_i32 = arith.constant 0 : i32
    %c0_i32_0 = arith.constant 0 : i32
    %c0_i32_1 = arith.constant 0 : i32
    return %c0_i32, %c0_i32_0 : i32, i32
  }
  func.func @transform_2(%arg0: i32) -> (i32, i32) {
    %c0_i32 = arith.constant 0 : i32
    %c0_i32_0 = arith.constant 0 : i32
    %c0_i32_1 = arith.constant 0 : i32
    return %c0_i32, %c0_i32_0 : i32, i32
  }
  func.func @transform_3(%arg0: i32) -> (i32, i32) {
    %c0_i32 = arith.constant 0 : i32
    %c0_i32_0 = arith.constant 0 : i32
    %c0_i32_1 = arith.constant 0 : i32
    return %c0_i32, %c0_i32_0 : i32, i32
  }
  func.func @transform_4(%arg0: i32) -> (i32, i32) {
    %c0_i32 = arith.constant 0 : i32
    %c0_i32_0 = arith.constant 0 : i32
    %c0_i32_1 = arith.constant 0 : i32
    return %c0_i32, %c0_i32_0 : i32, i32
  }
  func.func @transform_5(%arg0: i32) -> (i32, i32) {
    %c0_i32 = arith.constant 0 : i32
    %c0_i32_0 = arith.constant 0 : i32
    return %arg0, %c0_i32 : i32, i32
  }
}

</mosaic_0001>

<bundles_post_ra>
// kernel: tpu_custom_call.1
= control target key start
LH: loop header
LB: loop body
LE: loop exit
PB: predicated region body
PF: predicated region fallthrough
CT: control target
= control target key end

     0   :  { %10 = vsyncpa [#allocation3], 0  ;;  %s685_s0 = inlined_call_operand.hbm [shape: f32[16,128], index: 0, kind: input, shape index: {}]   ;;  %s686_s1 = inlined_call_operand.hbm [shape: f32[128,128], index: 1, kind: input, shape index: {}]   ;;  %s687_s2 = inlined_call_operand.vmem [shape: f32[1,128], index: 2, kind: input, shape index: {}]   ;;  %s688_s3 = inlined_call_operand.hbm [shape: f32[128,128], index: 3, kind: input, shape index: {}]   ;;  %s689_s4 = inlined_call_operand.vmem [shape: f32[1,128], index: 4, kind: input, shape index: {}]   ;;  %s690_s5 = inlined_call_operand.hbm [shape: f32[16,128], index: 5, kind: output, shape index: {}]  }
   0x1   :  { %11 = vsyncpa [#allocation6], 0 }
   0x2   :  { %12 = vsyncpa [#allocation4], 0  ;;  %s576_s18 = smov [#allocation5]   ;;  %s577_s20 = smov [#allocation2]  }
   0x3   :  { %s30_s19 = sshll.u32 %s576_s18, 4  ;;  %s18_s21 = sshll.u32 %s577_s20, 4  ;;  %s31_s19 = int_to_ptr.vmem [resolvable:$true] %s30_s19  ;;  %s612_s21 = int_to_ptr.vmem [resolvable:$true] %s18_s21 }
   0x4   :  { %s482_s24 = scalar_lea.hbm %s686_s1, 2048 }
   0x5   :  { %p483_p0 = scmp.ne.s32.totalorder %s686_s1, %s482_s24  ;;  %p486_p1 = scmp.lt.u32.totalorder %s482_s24, %s686_s1 }
   0x7   :  { %p488_p2 = pnand %p486_p1, %p483_p0 }
   0x9   :  { %491 = shalt.err (!%p488_p2)
}
   0xa   :  { %s492_s29 = scalar_lea.vmem %s31_s19, 2048  ;;  %p497_p4 = scmp.lt.s32.totalorder %s31_s19, %s31_s19 }
   0xb   :  { %p493_p3 = scmp.ne.s32.totalorder %s31_s19, %s492_s29  ;;  %p498_p5 = scmp.lt.s32.totalorder %s492_s29, %s492_s29 }
   0xd   :  { %p499_p6 = por %p498_p5, %p497_p4 }
   0xf   :  { %p500_p7 = pnand %p499_p6, %p493_p3 }
  0x11   :  { %503 = shalt.err (!%p500_p7)
}
  0x12   :  { %s578_s30 = smov 128   ;;  %s579_s6 = smov 8  }
  0x13   :  { %36 = dma.hbm_to_vmem [thread:$0]  %s686_s1, 2048, %s31_s19, [#allocation6], %s578_s30, %s578_s30, %s579_s6  }
  0x14   :  { %s504_s11 = scalar_lea.hbm %s685_s0, 256 }
  0x15   :  { %p505_p8 = scmp.ne.s32.totalorder %s685_s0, %s504_s11  ;;  %p508_p9 = scmp.lt.u32.totalorder %s504_s11, %s685_s0 }
  0x17   :  { %p510_p10 = pnand %p508_p9, %p505_p8 }
  0x19   :  { %513 = shalt.err (!%p510_p10)
}
  0x1a   :  { %s514_s16 = scalar_lea.vmem %s612_s21, 256  ;;  %p519_p12 = scmp.lt.s32.totalorder %s612_s21, %s612_s21 }
  0x1b   :  { %p515_p11 = scmp.ne.s32.totalorder %s612_s21, %s514_s16  ;;  %p520_p13 = scmp.lt.s32.totalorder %s514_s16, %s514_s16 }
  0x1d   :  { %p521_p0 = por %p520_p13, %p519_p12 }
  0x1f   :  { %p522_p1 = pnand %p521_p0, %p515_p11 }
  0x21   :  { %525 = shalt.err (!%p522_p1)
}
  0x22   :  { %24 = dma.hbm_to_vmem [thread:$0]  %s685_s0, 256, %s612_s21, [#allocation3], %s578_s30, %s578_s30, %s579_s6  }
  0x23   :  { %s580_s18 = smov [#allocation7]   ;;  %s526_s23 = scalar_lea.hbm %s688_s3, 2048 }
  0x24   :  { %s44_s19 = sshll.u32 %s580_s18, 4  ;;  %p527_p2 = scmp.ne.s32.totalorder %s688_s3, %s526_s23  ;;  %s45_s19 = int_to_ptr.vmem [resolvable:$true] %s44_s19 }
  0x25   :  { %p530_p3 = scmp.lt.u32.totalorder %s526_s23, %s688_s3 }
  0x27   :  { %p532_p4 = pnand %p530_p3, %p527_p2 }
  0x29   :  { %535 = shalt.err (!%p532_p4)
}
  0x2a   :  { %s536_s28 = scalar_lea.vmem %s45_s19, 2048  ;;  %p541_p6 = scmp.lt.s32.totalorder %s45_s19, %s45_s19 }
  0x2b   :  { %p537_p5 = scmp.ne.s32.totalorder %s45_s19, %s536_s28  ;;  %p542_p7 = scmp.lt.s32.totalorder %s536_s28, %s536_s28 }
  0x2d   :  { %p543_p8 = por %p542_p7, %p541_p6 }
  0x2f   :  { %p544_p9 = pnand %p543_p8, %p537_p5 }
  0x31   :  { %547 = shalt.err (!%p544_p9)
}
  0x32   :  { %50 = dma.hbm_to_vmem [thread:$0]  %s688_s3, 2048, %s45_s19, [#allocation6], %s578_s30, %s578_s30, %s579_s6  }
  0x33   :  { %570 = dma.done.wait [#allocation3], 256  }
  0x34   :  { %571 = vsyncadd [#allocation3], 4294967040 }
  0x35   :  { %572 = dma.done.wait [#allocation6], 4096  }
  0x36   :  { %573 = vsyncadd [#allocation6], 4294963200  ;;  %v64_v0 = vld [vmem:[#allocation5] sm:$0xff]  ;;  %v65_v1 = vld [vmem:[#allocation5 + $0x8] sm:$0xff]  ;;  %s581_s8 = smov [#allocation8]  }
  0x37   :  { %v66_v2 = vld [vmem:[#allocation5 + $0x10] sm:$0xff]  ;;  %v404_v3 = vpack.c.bf16 %v65_v1, %v64_v0  ;;  %v67_v4 = vld [vmem:[#allocation5 + $0x18] sm:$0xff]  ;;  %v68_v6 = vld [vmem:[#allocation5 + $0x20] sm:$0xff]  ;;  %s281_s9 = sshll.u32 %s581_s8, 4  ;;  %s282_s9 = int_to_ptr.vmem [resolvable:$true] %s281_s9 }
  0x38   :  { %v408_v5 = vpack.c.bf16 %v67_v4, %v66_v2  ;;  %v69_v7 = vld [vmem:[#allocation5 + $0x28] sm:$0xff]  ;;  %v62_v9 = vld [vmem:[#allocation2] sm:$0xff]  ;;  %v71_v11 = vld [vmem:[#allocation5 + $0x38] sm:$0xff]  ;;  %s548_s10 = scalar_lea.vmem %s282_s9, 256  ;;  %p553_p11 = scmp.lt.s32.totalorder %s282_s9, %s282_s9 }
  0x39   :  { %405 = vmatprep.subr.bf16.mxu0 %v404_v3  ;;  %v412_v8 = vpack.c.bf16 %v69_v7, %v68_v6  ;;  %v70_v10 = vld [vmem:[#allocation5 + $0x30] sm:$0xff]  ;;  %366 = vmatprep.mubr.f32.mxu0 %v62_v9  ;;  %v72_v13 = vld [vmem:[#allocation5 + $0x40] sm:$0xff]  ;;  %v73_v14 = vld [vmem:[#allocation5 + $0x48] sm:$0xff]  ;;  %p549_p10 = scmp.ne.s32.totalorder %s282_s9, %s548_s10  ;;  %p554_p12 = scmp.lt.s32.totalorder %s548_s10, %s548_s10 }
  0x3a   :  { %407 = vmatpush3.bf16.msra.mxu0 %v404_v3  ;;  %v416_v12 = vpack.c.bf16 %v71_v11, %v70_v10  ;;  %v420_v15 = vpack.c.bf16 %v73_v14, %v72_v13  ;;  %v74_v16 = vld [vmem:[#allocation5 + $0x50] sm:$0xff]  ;;  %v75_v17 = vld [vmem:[#allocation5 + $0x58] sm:$0xff]  ;;  %v76_v19 = vld [vmem:[#allocation5 + $0x60] sm:$0xff] }
  0x3b   :  { %409 = vmatprep.subr.bf16.mxu0 %v408_v5  ;;  %v424_v18 = vpack.c.bf16 %v75_v17, %v74_v16  ;;  %v77_v20 = vld [vmem:[#allocation5 + $0x68] sm:$0xff]  ;;  %v78_v22 = vld [vmem:[#allocation5 + $0x70] sm:$0xff]  ;;  %v79_v23 = vld [vmem:[#allocation5 + $0x78] sm:$0xff]  ;;  %p555_p13 = por %p554_p12, %p553_p11 }
  0x3c   :  { %v428_v21 = vpack.c.bf16 %v77_v20, %v76_v19  ;;  %v432_v24 = vpack.c.bf16 %v79_v23, %v78_v22  ;;  %v63_v25 = vld [vmem:[#allocation2 + $0x8] sm:$0xff]  ;;  %v176_v26 = vld [vmem:[#allocation7] sm:$0xff]  ;;  %v177_v27 = vld [vmem:[#allocation7 + $0x8] sm:$0xff] }
  0x3d   :  { %v436_v28 = vpack.c.bf16 %v177_v27, %v176_v26  ;;  %v178_v29 = vld [vmem:[#allocation7 + $0x10] sm:$0xff]  ;;  %v179_v30 = vld [vmem:[#allocation7 + $0x18] sm:$0xff]  ;;  %v180_v32 = vld [vmem:[#allocation7 + $0x20] sm:$0xff]  ;;  %p556_p0 = pnand %p555_p13, %p549_p10 }
  0x3e   :  { %411 = vmatpush3.bf16.msra.mxu0 %v408_v5  ;;  %v440_v31 = vpack.c.bf16 %v179_v30, %v178_v29  ;;  %v181_v33 = vld [vmem:[#allocation7 + $0x28] sm:$0xff]  ;;  %v182_v35 = vld [vmem:[#allocation7 + $0x30] sm:$0xff]  ;;  %v183_v36 = vld [vmem:[#allocation7 + $0x38] sm:$0xff] }
  0x3f   :  { %413 = vmatprep.subr.bf16.mxu0 %v412_v8  ;;  %437 = vmatprep.subr.bf16.mxu1 %v436_v28  ;;  %v444_v34 = vpack.c.bf16 %v181_v33, %v180_v32  ;;  %v448_v37 = vpack.c.bf16 %v183_v36, %v182_v35  ;;  %v184_v38 = vld [vmem:[#allocation7 + $0x40] sm:$0xff]  ;;  %v185_v39 = vld [vmem:[#allocation7 + $0x48] sm:$0xff]  ;;  %v186_v41 = vld [vmem:[#allocation7 + $0x50] sm:$0xff] }
  0x40   :  { %439 = vmatpush3.bf16.msra.mxu1 %v436_v28  ;;  %v452_v40 = vpack.c.bf16 %v185_v39, %v184_v38  ;;  %v187_v42 = vld [vmem:[#allocation7 + $0x58] sm:$0xff]  ;;  %v188_v44 = vld [vmem:[#allocation7 + $0x60] sm:$0xff]  ;;  %v189_v45 = vld [vmem:[#allocation7 + $0x68] sm:$0xff] }
  0x41   :  { %441 = vmatprep.subr.bf16.mxu1 %v440_v31  ;;  %v456_v43 = vpack.c.bf16 %v187_v42, %v186_v41  ;;  %v460_v46 = vpack.c.bf16 %v189_v45, %v188_v44  ;;  %v190_v47 = vld [vmem:[#allocation7 + $0x70] sm:$0xff]  ;;  %v191_v48 = vld [vmem:[#allocation7 + $0x78] sm:$0xff] }
  0x42   :  { %415 = vmatpush3.bf16.msra.mxu0 %v412_v8  ;;  %v464_v49 = vpack.c.bf16 %v191_v48, %v190_v47  ;;  %v294_v50 = vld [vmem:[%s687_s2] ss:$0 sm:$0xff] }
  0x43   :  { %417 = vmatprep.subr.bf16.mxu0 %v416_v12  ;;  %v297_v1 = vld [vmem:[%s689_s4] ss:$0 sm:$0xff] }
  0x44   :  { %443 = vmatpush3.bf16.msra.mxu1 %v440_v31 }
  0x45   :  { %445 = vmatprep.subr.bf16.mxu1 %v444_v34 }
  0x46   :  { %419 = vmatpush3.bf16.msra.mxu0 %v416_v12 }
  0x47   :  { %421 = vmatprep.subr.bf16.mxu0 %v420_v15 }
  0x48   :  { %447 = vmatpush3.bf16.msra.mxu1 %v444_v34 }
  0x49   :  { %449 = vmatprep.subr.bf16.mxu1 %v448_v37 }
  0x4a   :  { %423 = vmatpush3.bf16.msra.mxu0 %v420_v15 }
  0x4b   :  { %425 = vmatprep.subr.bf16.mxu0 %v424_v18 }
  0x4c   :  { %451 = vmatpush3.bf16.msra.mxu1 %v448_v37 }
  0x4d   :  { %453 = vmatprep.subr.bf16.mxu1 %v452_v40 }
  0x4e   :  { %427 = vmatpush3.bf16.msra.mxu0 %v424_v18 }
  0x4f   :  { %429 = vmatprep.subr.bf16.mxu0 %v428_v21 }
  0x50   :  { %455 = vmatpush3.bf16.msra.mxu1 %v452_v40 }
  0x51   :  { %457 = vmatprep.subr.bf16.mxu1 %v456_v43 }
  0x52   :  { %431 = vmatpush3.bf16.msra.mxu0 %v428_v21 }
  0x53   :  { %433 = vmatprep.subr.bf16.mxu0 %v432_v24 }
  0x54   :  { %459 = vmatpush3.bf16.msra.mxu1 %v456_v43 }
  0x55   :  { %461 = vmatprep.subr.bf16.mxu1 %v460_v46 }
  0x56   :  { %435 = vmatpush3.bf16.msra.mxu0 %v432_v24 }
  0x58   :  { %463 = vmatpush3.bf16.msra.mxu1 %v460_v46 }
  0x59   :  { %367 = vmatmul.mubr.f32.vlgmr.msra.gmra.mrb[0].mxu0 %v63_v25  ;;  %465 = vmatprep.subr.bf16.mxu1 %v464_v49 }
  0x5c   :  { %467 = vmatpush3.bf16.msra.mxu1 %v464_v49 }
 0x12c   :  { %v368_v51 = vpop.f32.mrb[0].mxu0 }
 0x12d   :  { %v159_v52 = vadd.f32 %v368_v51, %v294_v50  ;;  %v153_v53 = vpop.f32.mrb[1].mxu0 }
 0x12e   :  { %v154_v54 = vadd.f32 %v294_v50, %v153_v53 }
 0x12f   :  { %v296_v55 = vmul.f32 -1.442695, %v159_v52 }
 0x130   :  { %v295_v56 = vmul.f32 -1.442695, %v154_v54 }
 0x131   :  { %474 = vpow2.f32 %v296_v55 }
 0x132   :  { %476 = vpow2.f32 %v295_v56 }
 0x13b   :  { %v475_v57 = vpop.eup %474 }
 0x13c   :  { %v477_v58 = vpop.eup %476  ;;  %v169_v59 = vadd.f32 1.0, %v475_v57 }
 0x13d   :  { %v168_v60 = vadd.f32 1.0, %v477_v58 }
 0x13e   :  { %478 = vrcp.f32 %v169_v59 }
 0x13f   :  { %480 = vrcp.f32 %v168_v60 }
 0x148   :  { %v479_v61 = vpop.eup %478 }
 0x149   :  { %v481_v62 = vpop.eup %480  ;;  %v175_v0 = vmul.f32 %v479_v61, %v159_v52 }
 0x14a   :  { %v174_v63 = vmul.f32 %v481_v62, %v154_v54 }
 0x14c   :  { %401 = vmatprep.mubr.f32.mxu1 %v174_v63 }
 0x14d   :  { %402 = vmatmul.mubr.f32.vlgmr.msra.gmra.mrb[0].mxu1 %v175_v0 }
 0x220   :  { %v403_v2 = vpop.f32.mrb[0].mxu1 }
 0x221   :  { %v271_v3 = vadd.f32 %v403_v2, %v297_v1  ;;  %v265_v4 = vpop.f32.mrb[1].mxu1 }
 0x222   :  { %v266_v5 = vadd.f32 %v297_v1, %v265_v4 }
 0x223   :  { %275 = vst [vmem:[#allocation8 + $0x8] sm:$0xff] %v271_v3 }
 0x224   :  { %274 = vst [vmem:[#allocation8] sm:$0xff] %v266_v5 }
 0x225   :  { %559 = shalt.err (!%p556_p0)
}
 0x226   :  { %s560_s4 = scalar_lea.hbm %s690_s5, 256 }
 0x227   :  { %p561_p1 = scmp.ne.s32.totalorder %s690_s5, %s560_s4  ;;  %p564_p2 = scmp.lt.u32.totalorder %s560_s4, %s690_s5 }
 0x229   :  { %p566_p3 = pnand %p564_p2, %p561_p1 }
 0x22b   :  { %569 = shalt.err (!%p566_p3)
}
 0x22c   :  { %287 = dma.vmem_to_hbm [thread:$0]  %s282_s9, 256, %s690_s5, [#allocation4], %s578_s30, %s578_s30, %s579_s6  }
 0x22d   :  { %574 = dma.done.wait [#allocation4], 256  }
 0x22e   :  { %575 = vsyncadd [#allocation4], 4294967040 }
 0x22f   :  { %291 = vsyncpa [#allocation3], 1 }
 0x230   :  { %292 = vsyncpa [#allocation6], 1 }
 0x231   :  { %293 = vsyncpa [#allocation4], 1 }

</bundles_post_ra>
